<compile_context>
chip_gen: v7x
topology: tpu7x:2x2x1
jax: 0.10.0
libtpu: 0.0.40
codegen_flags: <defaults>
</compile_context>

<pallas_src>
import math

import jax
import jax.numpy as jnp
from jax import lax
from jax.experimental import pallas as pl
from jax.experimental.pallas import tpu as pltpu


def mha_kernel(x_ref, wqkv_ref, bqkv_ref, wo_ref, bo_ref, out_ref):
    B, S, D = x_ref.shape            # static Python ints
    H, d, _ = wo_ref.shape
    inv_sqrt_d = 1.0 / math.sqrt(d)

    # Fold (B, S) -> B*S rows for the projections (last dim unchanged -> cheap reshape).
    x2d = x_ref[...].reshape(B * S, D)                                   # (B*S, D)

    # One fused QKV projection: single MXU push, 24-lane-wide output.
    qkv = jnp.dot(x2d, wqkv_ref[...],
                  preferred_element_type=jnp.float32) + bqkv_ref[...]    # (B*S, 3*H*d)

    # Accumulate the output projection per head; no concat / transpose needed.
    acc = jnp.zeros((B * S, D), jnp.float32)
    for h in range(H):               # H is tiny & static -> unrolled
        q = qkv[:, h * d:(h + 1) * d].reshape(B, S, d)
        k = qkv[:, (H + h) * d:(H + h + 1) * d].reshape(B, S, d)
        v = qkv[:, (2 * H + h) * d:(2 * H + h + 1) * d].reshape(B, S, d)

        # Q @ K^T without materializing the transpose: contract d, batch over B.
        scores = lax.dot_general(
            q, k, (((2,), (2,)), ((0,), (0,))),
            preferred_element_type=jnp.float32) * inv_sqrt_d             # (B, S, S)

        # Numerically stable softmax; divide replaced by EUP reciprocal + multiply.
        scores = scores - jnp.max(scores, axis=-1, keepdims=True)
        p = jnp.exp(scores)
        denom = jnp.sum(p, axis=-1, keepdims=True)
        attn = p * pl.reciprocal(denom, approx=True)                     # (B, S, S)

        ctx = lax.dot_general(
            attn, v, (((2,), (1,)), ((0,), (0,))),
            preferred_element_type=jnp.float32)                          # (B, S, d)

        # Output projection accumulated per head (replaces concat + big matmul).
        acc = acc + jnp.dot(ctx.reshape(B * S, d), wo_ref[h],
                            preferred_element_type=jnp.float32)          # (B*S, D)

    out = acc + bo_ref[...]                                              # (B*S, D)
    out_ref[...] = out.reshape(B, S, D).astype(out_ref.dtype)


def multi_head_attention(x, wq, bq, wk, bk, wv, bv, wo, bo):
    """x: (B, S, D). wq/wk/wv: (H, D, d). bq/bk/bv: (H, 1, d). wo: (D, D). bo: (1, D)."""
    B, S, D = x.shape
    H, _, d = wq.shape

    # Host-side fusion of the 3*H per-head projection matrices into one (D, 3*H*d) weight.
    def heads_to_cols(w):            # (H, D, d) -> (D, H*d), head-major columns
        return jnp.transpose(w, (1, 0, 2)).reshape(D, H * d)

    wqkv = jnp.concatenate(
        [heads_to_cols(wq), heads_to_cols(wk), heads_to_cols(wv)], axis=1)   # (D, 3*H*d)
    bqkv = jnp.concatenate(
        [bq.reshape(1, H * d), bk.reshape(1, H * d), bv.reshape(1, H * d)], axis=1)
    wo_heads = wo.reshape(H, d, D)   # rows of wo are head-major (matches concat order)

    return pl.pallas_call(
        mha_kernel,
        out_shape=jax.ShapeDtypeStruct((B, S, D), x.dtype),
        grid=(1,),                   # single step: one TC, weights DMA'd once
        in_specs=[
            pl.BlockSpec((B, S, D), lambda i: (0, 0, 0)),       # x (full block)
            pl.BlockSpec((D, 3 * H * d), lambda i: (0, 0)),     # fused Wqkv
            pl.BlockSpec((1, 3 * H * d), lambda i: (0, 0)),     # fused bqkv
            pl.BlockSpec((H, d, D), lambda i: (0, 0, 0)),       # Wo per head
            pl.BlockSpec((1, D), lambda i: (0, 0)),             # bo
        ],
        out_specs=pl.BlockSpec((B, S, D), lambda i: (0, 0, 0)),
        compiler_params=pltpu.CompilerParams(
            dimension_semantics=("arbitrary",)),
    )(x, wqkv, bqkv, wo_heads, bo)


def reference_mha(x, wq, bq, wk, bk, wv, bv, wo, bo):
    """Pure-JAX reference matching the PyTorch forward (dropout = identity)."""
    H, D, d = wq.shape
    outs = []
    for h in range(H):
        q = x @ wq[h] + bq[h]
        k = x @ wk[h] + bk[h]
        v = x @ wv[h] + bv[h]
        s = (q @ jnp.swapaxes(k, -2, -1)) / math.sqrt(d)
        a = jax.nn.softmax(s, axis=-1)
        outs.append(a @ v)
    concat = jnp.concatenate(outs, axis=-1)
    return concat @ wo + bo


if __name__ == "__main__":
    d_model, num_heads = 8, 4
    d_head = d_model // num_heads
    B, S = 2, 8

    key = jax.random.PRNGKey(0)
    keys = jax.random.split(key, 10)

    # Deterministic parameter init (uniform +/- 1/sqrt(fan_in), like nn.Linear).
    lim = 1.0 / math.sqrt(d_model)
    wq = jax.random.uniform(keys[0], (num_heads, d_model, d_head), jnp.float32, -lim, lim)
    bq = jax.random.uniform(keys[1], (num_heads, 1, d_head), jnp.float32, -lim, lim)
    wk = jax.random.uniform(keys[2], (num_heads, d_model, d_head), jnp.float32, -lim, lim)
    bk = jax.random.uniform(keys[3], (num_heads, 1, d_head), jnp.float32, -lim, lim)
    wv = jax.random.uniform(keys[4], (num_heads, d_model, d_head), jnp.float32, -lim, lim)
    bv = jax.random.uniform(keys[5], (num_heads, 1, d_head), jnp.float32, -lim, lim)
    wo = jax.random.uniform(keys[6], (d_model, d_model), jnp.float32, -lim, lim)
    bo = jax.random.uniform(keys[7], (1, d_model), jnp.float32, -lim, lim)

    x = jax.random.normal(keys[8], (B, S, d_model), jnp.float32)

    out = multi_head_attention(x, wq, bq, wk, bk, wv, bv, wo, bo)
    out = jax.block_until_ready(out)

    ref = reference_mha(x, wq, bq, wk, bk, wv, bv, wo, bo)
    assert out.shape == (B, S, d_model)
    # Tolerance accounts for the approximate EUP reciprocal in the softmax normalization.
    assert jnp.allclose(out, ref, atol=2e-3, rtol=2e-3), "Pallas output mismatch vs reference"

    print("KERNEL_OK")
</pallas_src>

<mosaic_0001>
module attributes {stable_mosaic.version = 11 : i64} {
  func.func @mha_kernel(%arg0: i32, %arg1: memref<2x8x8xf32, #tpu.memory_space<vmem>>, %arg2: memref<8x24xf32, #tpu.memory_space<vmem>>, %arg3: memref<1x24xf32, #tpu.memory_space<vmem>>, %arg4: memref<4x2x8xf32, #tpu.memory_space<vmem>>, %arg5: memref<1x8xf32, #tpu.memory_space<vmem>>, %arg6: memref<2x8x8xf32, #tpu.memory_space<vmem>>) attributes {dimension_semantics = [#tpu.dimension_semantics<arbitrary>], iteration_bounds = array<i64: 1>, scalar_prefetch = 0 : i64, scratch_operands = 0 : i64, tpu.core_type = #tpu.core_type<tc>, window_params = [{pipeline_mode = #tpu.pipeline_mode<synchronous>, transform_indices = @transform_0, window_bounds = array<i64: 2, 8, 8>}, {pipeline_mode = #tpu.pipeline_mode<synchronous>, transform_indices = @transform_1, window_bounds = array<i64: 8, 24>}, {pipeline_mode = #tpu.pipeline_mode<synchronous>, transform_indices = @transform_2, window_bounds = array<i64: 1, 24>}, {pipeline_mode = #tpu.pipeline_mode<synchronous>, transform_indices = @transform_3, window_bounds = array<i64: 4, 2, 8>}, {pipeline_mode = #tpu.pipeline_mode<synchronous>, transform_indices = @transform_4, window_bounds = array<i64: 1, 8>}, {pipeline_mode = #tpu.pipeline_mode<synchronous>, transform_indices = @transform_5, window_bounds = array<i64: 2, 8, 8>}]} {
    %c0 = arith.constant 0 : index
    %c0_0 = arith.constant 0 : index
    %c0_1 = arith.constant 0 : index
    %0 = vector.load %arg1[%c0, %c0_0, %c0_1] : memref<2x8x8xf32, #tpu.memory_space<vmem>>, vector<2x8x8xf32>
    %1 = vector.shape_cast %0 : vector<2x8x8xf32> to vector<16x8xf32>
    %c0_2 = arith.constant 0 : index
    %c0_3 = arith.constant 0 : index
    %2 = vector.load %arg2[%c0_2, %c0_3] : memref<8x24xf32, #tpu.memory_space<vmem>>, vector<8x24xf32>
    %cst = arith.constant dense<0.000000e+00> : vector<16x24xf32>
    %3 = tpu.matmul %1, %2, %cst {dimension_numbers = #tpu.dot_dimension_numbers<[1], [0], [0], [1], [0, 0, 1, 1], [], []>} : vector<16x8xf32>, vector<8x24xf32>, vector<16x24xf32> -> vector<16x24xf32>
    %c0_4 = arith.constant 0 : index
    %c0_5 = arith.constant 0 : index
    %4 = vector.load %arg3[%c0_4, %c0_5] : memref<1x24xf32, #tpu.memory_space<vmem>>, vector<1x24xf32>
    %5 = vector.broadcast %4 : vector<1x24xf32> to vector<16x24xf32>
    %6 = arith.addf %3, %5 : vector<16x24xf32>
    %cst_6 = arith.constant 0.000000e+00 : f32
    %7 = vector.broadcast %cst_6 : f32 to vector<16x8xf32>
    %8 = vector.extract_strided_slice %6 {offsets = [0, 0], sizes = [16, 2], strides = [1, 1]} : vector<16x24xf32> to vector<16x2xf32>
    %9 = vector.shape_cast %8 : vector<16x2xf32> to vector<2x8x2xf32>
    %10 = vector.extract_strided_slice %6 {offsets = [0, 8], sizes = [16, 2], strides = [1, 1]} : vector<16x24xf32> to vector<16x2xf32>
    %11 = vector.shape_cast %10 : vector<16x2xf32> to vector<2x8x2xf32>
    %12 = vector.extract_strided_slice %6 {offsets = [0, 16], sizes = [16, 2], strides = [1, 1]} : vector<16x24xf32> to vector<16x2xf32>
    %13 = vector.shape_cast %12 : vector<16x2xf32> to vector<2x8x2xf32>
    %cst_7 = arith.constant dense<0.000000e+00> : vector<2x8x8xf32>
    %14 = tpu.matmul %9, %11, %cst_7 {dimension_numbers = #tpu.dot_dimension_numbers<[2], [2], [1], [1], [0, 0, 0, 1, 1, 1], [0], [0]>} : vector<2x8x2xf32>, vector<2x8x2xf32>, vector<2x8x8xf32> -> vector<2x8x8xf32>
    %cst_8 = arith.constant 0.707106769 : f32
    %15 = vector.broadcast %cst_8 : f32 to vector<2x8x8xf32>
    %16 = arith.mulf %14, %15 : vector<2x8x8xf32>
    %cst_9 = arith.constant dense<0xFF800000> : vector<2x8xf32>
    %17 = vector.multi_reduction <maximumf>, %16, %cst_9 [2] : vector<2x8x8xf32> to vector<2x8xf32>
    %18 = vector.shape_cast %17 : vector<2x8xf32> to vector<2x8x1xf32>
    %19 = vector.broadcast %18 : vector<2x8x1xf32> to vector<2x8x8xf32>
    %20 = arith.subf %16, %19 : vector<2x8x8xf32>
    %21 = math.exp %20 : vector<2x8x8xf32>
    %cst_10 = arith.constant dense<0.000000e+00> : vector<2x8xf32>
    %22 = vector.multi_reduction <add>, %21, %cst_10 [2] : vector<2x8x8xf32> to vector<2x8xf32>
    %23 = vector.shape_cast %22 : vector<2x8xf32> to vector<2x8x1xf32>
    %24 = tpu.reciprocal %23 {approx = true} : vector<2x8x1xf32> -> vector<2x8x1xf32>
    %25 = vector.broadcast %24 : vector<2x8x1xf32> to vector<2x8x8xf32>
    %26 = arith.mulf %21, %25 : vector<2x8x8xf32>
    %cst_11 = arith.constant dense<0.000000e+00> : vector<2x8x2xf32>
    %27 = tpu.matmul %26, %13, %cst_11 {dimension_numbers = #tpu.dot_dimension_numbers<[2], [1], [1], [2], [0, 0, 0, 1, 1, 2], [0], [0]>} : vector<2x8x8xf32>, vector<2x8x2xf32>, vector<2x8x2xf32> -> vector<2x8x2xf32>
    %28 = vector.shape_cast %27 : vector<2x8x2xf32> to vector<16x2xf32>
    %c0_12 = arith.constant 0 : index
    %c0_13 = arith.constant 0 : index
    %c0_14 = arith.constant 0 : index
    %29 = vector.load %arg4[%c0_12, %c0_13, %c0_14] : memref<4x2x8xf32, #tpu.memory_space<vmem>>, vector<1x2x8xf32>
    %30 = vector.shape_cast %29 : vector<1x2x8xf32> to vector<2x8xf32>
    %cst_15 = arith.constant dense<0.000000e+00> : vector<16x8xf32>
    %31 = tpu.matmul %28, %30, %cst_15 {dimension_numbers = #tpu.dot_dimension_numbers<[1], [0], [0], [1], [0, 0, 1, 1], [], []>} : vector<16x2xf32>, vector<2x8xf32>, vector<16x8xf32> -> vector<16x8xf32>
    %32 = arith.addf %7, %31 : vector<16x8xf32>
    %33 = vector.extract_strided_slice %6 {offsets = [0, 2], sizes = [16, 2], strides = [1, 1]} : vector<16x24xf32> to vector<16x2xf32>
    %34 = vector.shape_cast %33 : vector<16x2xf32> to vector<2x8x2xf32>
    %35 = vector.extract_strided_slice %6 {offsets = [0, 10], sizes = [16, 2], strides = [1, 1]} : vector<16x24xf32> to vector<16x2xf32>
    %36 = vector.shape_cast %35 : vector<16x2xf32> to vector<2x8x2xf32>
    %37 = vector.extract_strided_slice %6 {offsets = [0, 18], sizes = [16, 2], strides = [1, 1]} : vector<16x24xf32> to vector<16x2xf32>
    %38 = vector.shape_cast %37 : vector<16x2xf32> to vector<2x8x2xf32>
    %cst_16 = arith.constant dense<0.000000e+00> : vector<2x8x8xf32>
    %39 = tpu.matmul %34, %36, %cst_16 {dimension_numbers = #tpu.dot_dimension_numbers<[2], [2], [1], [1], [0, 0, 0, 1, 1, 1], [0], [0]>} : vector<2x8x2xf32>, vector<2x8x2xf32>, vector<2x8x8xf32> -> vector<2x8x8xf32>
    %cst_17 = arith.constant 0.707106769 : f32
    %40 = vector.broadcast %cst_17 : f32 to vector<2x8x8xf32>
    %41 = arith.mulf %39, %40 : vector<2x8x8xf32>
    %cst_18 = arith.constant dense<0xFF800000> : vector<2x8xf32>
    %42 = vector.multi_reduction <maximumf>, %41, %cst_18 [2] : vector<2x8x8xf32> to vector<2x8xf32>
    %43 = vector.shape_cast %42 : vector<2x8xf32> to vector<2x8x1xf32>
    %44 = vector.broadcast %43 : vector<2x8x1xf32> to vector<2x8x8xf32>
    %45 = arith.subf %41, %44 : vector<2x8x8xf32>
    %46 = math.exp %45 : vector<2x8x8xf32>
    %cst_19 = arith.constant dense<0.000000e+00> : vector<2x8xf32>
    %47 = vector.multi_reduction <add>, %46, %cst_19 [2] : vector<2x8x8xf32> to vector<2x8xf32>
    %48 = vector.shape_cast %47 : vector<2x8xf32> to vector<2x8x1xf32>
    %49 = tpu.reciprocal %48 {approx = true} : vector<2x8x1xf32> -> vector<2x8x1xf32>
    %50 = vector.broadcast %49 : vector<2x8x1xf32> to vector<2x8x8xf32>
    %51 = arith.mulf %46, %50 : vector<2x8x8xf32>
    %cst_20 = arith.constant dense<0.000000e+00> : vector<2x8x2xf32>
    %52 = tpu.matmul %51, %38, %cst_20 {dimension_numbers = #tpu.dot_dimension_numbers<[2], [1], [1], [2], [0, 0, 0, 1, 1, 2], [0], [0]>} : vector<2x8x8xf32>, vector<2x8x2xf32>, vector<2x8x2xf32> -> vector<2x8x2xf32>
    %53 = vector.shape_cast %52 : vector<2x8x2xf32> to vector<16x2xf32>
    %c1 = arith.constant 1 : index
    %c0_21 = arith.constant 0 : index
    %c0_22 = arith.constant 0 : index
    %54 = vector.load %arg4[%c1, %c0_21, %c0_22] : memref<4x2x8xf32, #tpu.memory_space<vmem>>, vector<1x2x8xf32>
    %55 = vector.shape_cast %54 : vector<1x2x8xf32> to vector<2x8xf32>
    %cst_23 = arith.constant dense<0.000000e+00> : vector<16x8xf32>
    %56 = tpu.matmul %53, %55, %cst_23 {dimension_numbers = #tpu.dot_dimension_numbers<[1], [0], [0], [1], [0, 0, 1, 1], [], []>} : vector<16x2xf32>, vector<2x8xf32>, vector<16x8xf32> -> vector<16x8xf32>
    %57 = arith.addf %32, %56 : vector<16x8xf32>
    %58 = vector.extract_strided_slice %6 {offsets = [0, 4], sizes = [16, 2], strides = [1, 1]} : vector<16x24xf32> to vector<16x2xf32>
    %59 = vector.shape_cast %58 : vector<16x2xf32> to vector<2x8x2xf32>
    %60 = vector.extract_strided_slice %6 {offsets = [0, 12], sizes = [16, 2], strides = [1, 1]} : vector<16x24xf32> to vector<16x2xf32>
    %61 = vector.shape_cast %60 : vector<16x2xf32> to vector<2x8x2xf32>
    %62 = vector.extract_strided_slice %6 {offsets = [0, 20], sizes = [16, 2], strides = [1, 1]} : vector<16x24xf32> to vector<16x2xf32>
    %63 = vector.shape_cast %62 : vector<16x2xf32> to vector<2x8x2xf32>
    %cst_24 = arith.constant dense<0.000000e+00> : vector<2x8x8xf32>
    %64 = tpu.matmul %59, %61, %cst_24 {dimension_numbers = #tpu.dot_dimension_numbers<[2], [2], [1], [1], [0, 0, 0, 1, 1, 1], [0], [0]>} : vector<2x8x2xf32>, vector<2x8x2xf32>, vector<2x8x8xf32> -> vector<2x8x8xf32>
    %cst_25 = arith.constant 0.707106769 : f32
    %65 = vector.broadcast %cst_25 : f32 to vector<2x8x8xf32>
    %66 = arith.mulf %64, %65 : vector<2x8x8xf32>
    %cst_26 = arith.constant dense<0xFF800000> : vector<2x8xf32>
    %67 = vector.multi_reduction <maximumf>, %66, %cst_26 [2] : vector<2x8x8xf32> to vector<2x8xf32>
    %68 = vector.shape_cast %67 : vector<2x8xf32> to vector<2x8x1xf32>
    %69 = vector.broadcast %68 : vector<2x8x1xf32> to vector<2x8x8xf32>
    %70 = arith.subf %66, %69 : vector<2x8x8xf32>
    %71 = math.exp %70 : vector<2x8x8xf32>
    %cst_27 = arith.constant dense<0.000000e+00> : vector<2x8xf32>
    %72 = vector.multi_reduction <add>, %71, %cst_27 [2] : vector<2x8x8xf32> to vector<2x8xf32>
    %73 = vector.shape_cast %72 : vector<2x8xf32> to vector<2x8x1xf32>
    %74 = tpu.reciprocal %73 {approx = true} : vector<2x8x1xf32> -> vector<2x8x1xf32>
    %75 = vector.broadcast %74 : vector<2x8x1xf32> to vector<2x8x8xf32>
    %76 = arith.mulf %71, %75 : vector<2x8x8xf32>
    %cst_28 = arith.constant dense<0.000000e+00> : vector<2x8x2xf32>
    %77 = tpu.matmul %76, %63, %cst_28 {dimension_numbers = #tpu.dot_dimension_numbers<[2], [1], [1], [2], [0, 0, 0, 1, 1, 2], [0], [0]>} : vector<2x8x8xf32>, vector<2x8x2xf32>, vector<2x8x2xf32> -> vector<2x8x2xf32>
    %78 = vector.shape_cast %77 : vector<2x8x2xf32> to vector<16x2xf32>
    %c2 = arith.constant 2 : index
    %c0_29 = arith.constant 0 : index
    %c0_30 = arith.constant 0 : index
    %79 = vector.load %arg4[%c2, %c0_29, %c0_30] : memref<4x2x8xf32, #tpu.memory_space<vmem>>, vector<1x2x8xf32>
    %80 = vector.shape_cast %79 : vector<1x2x8xf32> to vector<2x8xf32>
    %cst_31 = arith.constant dense<0.000000e+00> : vector<16x8xf32>
    %81 = tpu.matmul %78, %80, %cst_31 {dimension_numbers = #tpu.dot_dimension_numbers<[1], [0], [0], [1], [0, 0, 1, 1], [], []>} : vector<16x2xf32>, vector<2x8xf32>, vector<16x8xf32> -> vector<16x8xf32>
    %82 = arith.addf %57, %81 : vector<16x8xf32>
    %83 = vector.extract_strided_slice %6 {offsets = [0, 6], sizes = [16, 2], strides = [1, 1]} : vector<16x24xf32> to vector<16x2xf32>
    %84 = vector.shape_cast %83 : vector<16x2xf32> to vector<2x8x2xf32>
    %85 = vector.extract_strided_slice %6 {offsets = [0, 14], sizes = [16, 2], strides = [1, 1]} : vector<16x24xf32> to vector<16x2xf32>
    %86 = vector.shape_cast %85 : vector<16x2xf32> to vector<2x8x2xf32>
    %87 = vector.extract_strided_slice %6 {offsets = [0, 22], sizes = [16, 2], strides = [1, 1]} : vector<16x24xf32> to vector<16x2xf32>
    %88 = vector.shape_cast %87 : vector<16x2xf32> to vector<2x8x2xf32>
    %cst_32 = arith.constant dense<0.000000e+00> : vector<2x8x8xf32>
    %89 = tpu.matmul %84, %86, %cst_32 {dimension_numbers = #tpu.dot_dimension_numbers<[2], [2], [1], [1], [0, 0, 0, 1, 1, 1], [0], [0]>} : vector<2x8x2xf32>, vector<2x8x2xf32>, vector<2x8x8xf32> -> vector<2x8x8xf32>
    %cst_33 = arith.constant 0.707106769 : f32
    %90 = vector.broadcast %cst_33 : f32 to vector<2x8x8xf32>
    %91 = arith.mulf %89, %90 : vector<2x8x8xf32>
    %cst_34 = arith.constant dense<0xFF800000> : vector<2x8xf32>
    %92 = vector.multi_reduction <maximumf>, %91, %cst_34 [2] : vector<2x8x8xf32> to vector<2x8xf32>
    %93 = vector.shape_cast %92 : vector<2x8xf32> to vector<2x8x1xf32>
    %94 = vector.broadcast %93 : vector<2x8x1xf32> to vector<2x8x8xf32>
    %95 = arith.subf %91, %94 : vector<2x8x8xf32>
    %96 = math.exp %95 : vector<2x8x8xf32>
    %cst_35 = arith.constant dense<0.000000e+00> : vector<2x8xf32>
    %97 = vector.multi_reduction <add>, %96, %cst_35 [2] : vector<2x8x8xf32> to vector<2x8xf32>
    %98 = vector.shape_cast %97 : vector<2x8xf32> to vector<2x8x1xf32>
    %99 = tpu.reciprocal %98 {approx = true} : vector<2x8x1xf32> -> vector<2x8x1xf32>
    %100 = vector.broadcast %99 : vector<2x8x1xf32> to vector<2x8x8xf32>
    %101 = arith.mulf %96, %100 : vector<2x8x8xf32>
    %cst_36 = arith.constant dense<0.000000e+00> : vector<2x8x2xf32>
    %102 = tpu.matmul %101, %88, %cst_36 {dimension_numbers = #tpu.dot_dimension_numbers<[2], [1], [1], [2], [0, 0, 0, 1, 1, 2], [0], [0]>} : vector<2x8x8xf32>, vector<2x8x2xf32>, vector<2x8x2xf32> -> vector<2x8x2xf32>
    %103 = vector.shape_cast %102 : vector<2x8x2xf32> to vector<16x2xf32>
    %c3 = arith.constant 3 : index
    %c0_37 = arith.constant 0 : index
    %c0_38 = arith.constant 0 : index
    %104 = vector.load %arg4[%c3, %c0_37, %c0_38] : memref<4x2x8xf32, #tpu.memory_space<vmem>>, vector<1x2x8xf32>
    %105 = vector.shape_cast %104 : vector<1x2x8xf32> to vector<2x8xf32>
    %cst_39 = arith.constant dense<0.000000e+00> : vector<16x8xf32>
    %106 = tpu.matmul %103, %105, %cst_39 {dimension_numbers = #tpu.dot_dimension_numbers<[1], [0], [0], [1], [0, 0, 1, 1], [], []>} : vector<16x2xf32>, vector<2x8xf32>, vector<16x8xf32> -> vector<16x8xf32>
    %107 = arith.addf %82, %106 : vector<16x8xf32>
    %c0_40 = arith.constant 0 : index
    %c0_41 = arith.constant 0 : index
    %108 = vector.load %arg5[%c0_40, %c0_41] : memref<1x8xf32, #tpu.memory_space<vmem>>, vector<1x8xf32>
    %109 = vector.broadcast %108 : vector<1x8xf32> to vector<16x8xf32>
    %110 = arith.addf %107, %109 : vector<16x8xf32>
    %111 = vector.shape_cast %110 : vector<16x8xf32> to vector<2x8x8xf32>
    %c0_42 = arith.constant 0 : index
    %c0_43 = arith.constant 0 : index
    %c0_44 = arith.constant 0 : index
    %112 = vector.load %arg6[%c0_42, %c0_43, %c0_44] : memref<2x8x8xf32, #tpu.memory_space<vmem>>, vector<2x8x8xf32>
    tpu.vector_store %arg6[%c0_42, %c0_43, %c0_44], %111 {strides = array<i32>} : memref<2x8x8xf32, #tpu.memory_space<vmem>>, vector<2x8x8xf32>,
    return
  }
  func.func @transform_0(%arg0: i32) -> (i32, i32, i32) {
    %c0_i32 = arith.constant 0 : i32
    %c0_i32_0 = arith.constant 0 : i32
    %c0_i32_1 = arith.constant 0 : i32
    %c0_i32_2 = arith.constant 0 : i32
    return %c0_i32, %c0_i32_0, %c0_i32_1 : i32, i32, i32
  }
  func.func @transform_1(%arg0: i32) -> (i32, i32) {
    %c0_i32 = arith.constant 0 : i32
    %c0_i32_0 = arith.constant 0 : i32
    %c0_i32_1 = arith.constant 0 : i32
    return %c0_i32, %c0_i32_0 : i32, i32
  }
  func.func @transform_2(%arg0: i32) -> (i32, i32) {
    %c0_i32 = arith.constant 0 : i32
    %c0_i32_0 = arith.constant 0 : i32
    %c0_i32_1 = arith.constant 0 : i32
    return %c0_i32, %c0_i32_0 : i32, i32
  }
  func.func @transform_3(%arg0: i32) -> (i32, i32, i32) {
    %c0_i32 = arith.constant 0 : i32
    %c0_i32_0 = arith.constant 0 : i32
    %c0_i32_1 = arith.constant 0 : i32
    %c0_i32_2 = arith.constant 0 : i32
    return %c0_i32, %c0_i32_0, %c0_i32_1 : i32, i32, i32
  }
  func.func @transform_4(%arg0: i32) -> (i32, i32) {
    %c0_i32 = arith.constant 0 : i32
    %c0_i32_0 = arith.constant 0 : i32
    %c0_i32_1 = arith.constant 0 : i32
    return %c0_i32, %c0_i32_0 : i32, i32
  }
  func.func @transform_5(%arg0: i32) -> (i32, i32, i32) {
    %c0_i32 = arith.constant 0 : i32
    %c0_i32_0 = arith.constant 0 : i32
    %c0_i32_1 = arith.constant 0 : i32
    %c0_i32_2 = arith.constant 0 : i32
    return %c0_i32, %c0_i32_0, %c0_i32_1 : i32, i32, i32
  }
}

</mosaic_0001>

<bundles_post_ra>
// kernel: tpu_custom_call.1
= control target key start
LH: loop header
LB: loop body
LE: loop exit
PB: predicated region body
PF: predicated region fallthrough
CT: control target
= control target key end

     0   :  { %10 = vsyncpa [#allocation3], 0  ;;  %s2420_s0 = inlined_call_operand.hbm [shape: f32[2,8,8], index: 0, kind: input, shape index: {}]   ;;  %s2421_s1 = inlined_call_operand.hbm [shape: f32[8,24], index: 1, kind: input, shape index: {}]   ;;  %s2422_s2 = inlined_call_operand.vmem [shape: f32[1,24], index: 2, kind: input, shape index: {}]   ;;  %s2423_s3 = inlined_call_operand.vmem [shape: f32[4,2,8], index: 3, kind: input, shape index: {}]   ;;  %s2424_s4 = inlined_call_operand.vmem [shape: f32[1,8], index: 4, kind: input, shape index: {}]   ;;  %s2425_s5 = inlined_call_operand.hbm [shape: f32[2,8,8], index: 5, kind: output, shape index: {}]  }
   0x1   :  { %11 = vsyncpa [#allocation6], 0 }
   0x2   :  { %12 = vsyncpa [#allocation4], 0  ;;  %s2166_s18 = smov [#allocation2]   ;;  %s2094_s22 = scalar_lea.hbm %s2420_s0, 256 }
   0x3   :  { %s18_s19 = sshll.u32 %s2166_s18, 4  ;;  %p2095_p0 = scmp.ne.s32.totalorder %s2420_s0, %s2094_s22  ;;  %s19_s19 = int_to_ptr.vmem [resolvable:$true] %s18_s19 }
   0x4   :  { %p2098_p1 = scmp.lt.u32.totalorder %s2094_s22, %s2420_s0 }
   0x6   :  { %p2100_p2 = pnand %p2098_p1, %p2095_p0 }
   0x8   :  { %2103 = shalt.err (!%p2100_p2)
}
   0x9   :  { %s2104_s27 = scalar_lea.vmem %s19_s19, 256  ;;  %p2109_p4 = scmp.lt.s32.totalorder %s19_s19, %s19_s19 }
   0xa   :  { %p2105_p3 = scmp.ne.s32.totalorder %s19_s19, %s2104_s27  ;;  %p2110_p5 = scmp.lt.s32.totalorder %s2104_s27, %s2104_s27 }
   0xc   :  { %p2111_p6 = por %p2110_p5, %p2109_p4 }
   0xe   :  { %p2112_p7 = pnand %p2111_p6, %p2105_p3 }
  0x10   :  { %2115 = shalt.err (!%p2112_p7)
}
  0x11   :  { %s2167_s28 = smov 128   ;;  %s2168_s29 = smov 8  }
  0x12   :  { %24 = dma.hbm_to_vmem [thread:$0]  %s2420_s0, 256, %s19_s19, [#allocation3], %s2167_s28, %s2167_s28, %s2168_s29  }
  0x13   :  { %s2169_s7 = smov [#allocation5]   ;;  %s2116_s11 = scalar_lea.hbm %s2421_s1, 128 }
  0x14   :  { %s31_s8 = sshll.u32 %s2169_s7, 4  ;;  %p2117_p8 = scmp.ne.s32.totalorder %s2421_s1, %s2116_s11  ;;  %s32_s8 = int_to_ptr.vmem [resolvable:$true] %s31_s8 }
  0x15   :  { %p2120_p9 = scmp.lt.u32.totalorder %s2116_s11, %s2421_s1 }
  0x17   :  { %p2122_p10 = pnand %p2120_p9, %p2117_p8 }
  0x19   :  { %2125 = shalt.err (!%p2122_p10)
}
  0x1a   :  { %s2126_s16 = scalar_lea.vmem %s32_s8, 128  ;;  %p2131_p12 = scmp.lt.s32.totalorder %s32_s8, %s32_s8 }
  0x1b   :  { %p2127_p11 = scmp.ne.s32.totalorder %s32_s8, %s2126_s16  ;;  %p2132_p13 = scmp.lt.s32.totalorder %s2126_s16, %s2126_s16 }
  0x1d   :  { %p2133_p0 = por %p2132_p13, %p2131_p12 }
  0x1f   :  { %p2134_p1 = pnand %p2133_p0, %p2127_p11 }
  0x21   :  { %2137 = shalt.err (!%p2134_p1)
}
  0x22   :  { %34 = dma.hbm_to_vmem [thread:$0]  %s2421_s1, 128, %s32_s8, [#allocation6]  }
  0x23   :  { %2160 = dma.done.wait [#allocation3], 256  }
  0x24   :  { %2161 = vsyncadd [#allocation3], 4294967040 }
  0x25   :  { %2162 = dma.done.wait [#allocation6], 128  }
  0x26   :  { %2163 = vsyncadd [#allocation6], 4294967168  ;;  %vm57_vm0 = vcmask 64512   ;;  %v49_v0 = vld [vmem:[#allocation5] sm:$0xff]  ;;  %v47_v1 = vld [vmem:[#allocation2] sm:$0xff]  ;;  %v2170_v3 = vmov 0.0  }
  0x27   :  { %v48_v2 = vld [vmem:[#allocation2 + $0x8] sm:$0xff]  ;;  %1933 = vmatprep.subr.mxu0 %v49_v0  ;;  %1935 = vmatprep.mubr.msk.f32.mxu0 %vm57_vm0, %v47_v1  ;;  %vm2171_vm1 = vmmov 0   ;;  %v1843_v4 = vld [vmem:[%s2422_s2] ss:$0 sm:$0xff]  ;;  %s2172_s19 = smov 120   ;;  %s2173_s20 = smov 112  }
  0x28   :  { %1934 = vmatpush3.msra.mxu0 %v49_v0  ;;  %1948 = vmatprep.subr.mxu1 %v2170_v3  ;;  %s2174_s21 = smov 126   ;;  %vm142_vm2 = vcmask 15360   ;;  %s2175_s2 = smov 118   ;;  %vm811_vm3 = vcmask 1041408  }
  0x29   :  { %1936 = vmatmul.mubr.msk.f32.vlgmr.msra.gmra.mrb[0].mxu0 %vm57_vm0, %v48_v2  ;;  %1938 = vmatprep.subr.mxu0 %v2170_v3  ;;  %s2176_s22 = smov 116   ;;  %s2177_s23 = smov 110  }
  0x2a   :  { %1940 = vmatprep.mubr.msk.f32.mxu0 %vm2171_vm1, %v2170_v3  ;;  %1950 = vmatprep.mubr.msk.f32.mxu1 %vm2171_vm1, %v2170_v3  ;;  %s2178_s24 = smov 124   ;;  %s2179_s25 = smov 108  }
  0x2b   :  { %s2180_s26 = smov 114   ;;  %s2181_s27 = smov 122  }
  0x2c   :  { %s2182_s11 = smov 106   ;;  %s2183_s15 = smov [#allocation7]  }
  0x2d   :  { %s1830_s16 = sshll.u32 %s2183_s15, 4  ;;  %s1831_s16 = int_to_ptr.vmem [resolvable:$true] %s1830_s16 }
  0x2e   :  { %s2138_s0 = scalar_lea.vmem %s1831_s16, 256  ;;  %p2143_p3 = scmp.lt.s32.totalorder %s1831_s16, %s1831_s16 }
  0x2f   :  { %p2139_p2 = scmp.ne.s32.totalorder %s1831_s16, %s2138_s0  ;;  %p2144_p4 = scmp.lt.s32.totalorder %s2138_s0, %s2138_s0 }
  0x31   :  { %p2145_p5 = por %p2144_p4, %p2143_p3 }
  0x33   :  { %p2146_p6 = pnand %p2145_p5, %p2139_p2 }
  0xfc   :  { %v1937_v5 = vpop.f32.mrb[0].mxu0 }
  0xfd   :  { %v130_v6 = vpop.f32.mrb[1].mxu0  ;;  %v2255_v8 = vadd.f32 %v1937_v5, %v1843_v4 }
  0xfe   :  { %v2252_v7 = vadd.f32 %v1843_v4, %v130_v6 }
 0x100   :  { %140 = vrot.lane.b32.xlu0 %v2252_v7, %s2172_s19 }
 0x104   :  { %218 = vrot.lane.b32.xlu0 %v2255_v8, %s2172_s19 }
 0x108   :  { %394 = vrot.lane.b32.xlu0 %v2255_v8, %s2173_s20 }
 0x10c   :  { %549 = vrot.lane.b32.xlu0 %v2255_v8, %s2174_s21 }
 0x172   :  { %v141_v9 = vpop.permute.xlu0 %140 }
 0x173   :  { %1939 = vmatpush3.xpose.msk.msra.mxu0 %vm142_vm2, %v141_v9 }
 0x174   :  { %1943 = vmatprep.subr.mxu0 %v2170_v3 }
 0x176   :  { %1941 = vmatmul.mubr.msk.f32.vlgmr.msra.gmra.mrb[2].mxu0 %vm142_vm2, %v2252_v7  ;;  %v219_v10 = vpop.permute.xlu0 %218 }
 0x177   :  { %1944 = vmatpush3.xpose.msk.msra.mxu0 %vm142_vm2, %v219_v10  ;;  %1945 = vmatprep.mubr.msk.f32.mxu0 %vm2171_vm1, %v2170_v3 }
 0x178   :  { %1953 = vmatprep.subr.mxu0 %v2170_v3 }
 0x17a   :  { %1946 = vmatmul.mubr.msk.f32.vlgmr.msra.gmra.mrb[4].mxu0 %vm142_vm2, %v2255_v8  ;;  %v395_v11 = vpop.permute.xlu0 %394 }
 0x17b   :  { %1954 = vmatpush3.msra.mxu0 %v395_v11  ;;  %1955 = vmatprep.mubr.msk.f32.mxu0 %vm2171_vm1, %v2170_v3 }
 0x17c   :  { %1963 = vmatprep.subr.mxu0 %v2170_v3 }
 0x17e   :  { %v550_v20 = vpop.permute.xlu0 %549 }
 0x249   :  { %v213_v12 = vpop.f32.mrb[2].mxu0 }
 0x24a   :  { %v294_v13 = vmul.f32 0.70710677, %v213_v12  ;;  %v1942_v14 = vpop.f32.mrb[3].mxu0 }
 0x24b   :  { %v1858_v14 = vld [vmem:[%s2423_s3 + $0x2] sm:$0x3] }
 0x24c   :  { %v296_v15 = vsel %vm57_vm0, %v294_v13, -inf }
 0x24d   :  { %297 = vmax.xlane.f32.xlu0 %v296_v15  ;;  %v290_v16 = vpop.f32.mrb[4].mxu0  ;;  %v470_v15 = vld [vmem:[%s2423_s3] sm:$0x3] }
 0x24e   :  { %v295_v17 = vmul.f32 0.70710677, %v290_v16  ;;  %v1947_v18 = vpop.f32.mrb[5].mxu0 }
 0x250   :  { %v299_v19 = vsel %vm57_vm0, %v295_v17, -inf }
 0x251   :  { %300 = vmax.xlane.f32.xlu1 %v299_v19 }
 0x263   :  { %318 = vrot.lane.b32.xlu0 %v2252_v7, %s2173_s20 }
 0x267   :  { %471 = vrot.lane.b32.xlu0 %v2252_v7, %s2174_s21 }
 0x2da   :  { %v298_v21 = vpop.xlane.xlu0 %297 }
 0x2db   :  { %v302_v28 = vsub.f32 %v294_v13, %v298_v21 }
 0x2dd   :  { %v304_v29 = vmul.f32 1.442695, %v302_v28 }
 0x2de   :  { %v301_v22 = vpop.xlane.xlu1 %300  ;;  %v319_v23 = vpop.permute.xlu0 %318 }
 0x2df   :  { %v303_v24 = vsub.f32 %v295_v17, %v301_v22  ;;  %1949 = vmatpush3.msra.mxu1 %v319_v23 }
 0x2e0   :  { %1958 = vmatprep.subr.mxu1 %v2170_v3 }
 0x2e1   :  { %v306_v25 = vmul.f32 1.442695, %v303_v24 }
 0x2e2   :  { %v472_v40 = vpop.permute.xlu0 %471 }
 0x2e3   :  { %2062 = vpow2.f32 %v306_v25 }
 0x2e4   :  { %2064 = vpow2.f32 %v304_v29 }
 0x2ed   :  { %v2063_v26 = vpop.eup %2062 }
 0x2ee   :  { %v311_v27 = vsel %vm57_vm0, %v2063_v26, 0.0  ;;  %v2065_v30 = vpop.eup %2064 }
 0x2ef   :  { %312 = vadd.xlane.f32.xlu1 %v311_v27  ;;  %v308_v31 = vsel %vm57_vm0, %v2065_v30, 0.0 }
 0x300   :  { %551 = vrot.lane.b32.xlu1 %v2255_v8, %s2175_s2 }
 0x324   :  { %309 = vadd.xlane.f32.xlu1 %v308_v31 }
 0x335   :  { %473 = vrot.lane.b32.xlu1 %v2252_v7, %s2175_s2 }
 0x339   :  { %976 = vrot.lane.b32.xlu1 %v2252_v7, %s2176_s22 }
 0x37c   :  { %v313_v32 = vpop.xlane.xlu1 %312 }
 0x37d   :  { %2066 = vrcp.f32 %v313_v32 }
 0x380   :  { %v552_v35 = vpop.permute.xlu1 %551 }
 0x387   :  { %v2067_v33 = vpop.eup %2066 }
 0x388   :  { %v317_v34 = vmul.f32 %v2067_v33, %v2063_v26 }
 0x38a   :  { %1956 = vmatmul.mubr.msk.f32.vlgmr.msra.gmra.mrb[6].mxu0 %vm57_vm0, %v317_v34 }
 0x38b   :  { %1964 = vmatpush3.xpose.msk.msra.mxu0 %vm142_vm2, %v552_v35  ;;  %1965 = vmatprep.mubr.msk.f32.mxu0 %vm2171_vm1, %v2170_v3 }
 0x38c   :  { %1973 = vmatprep.subr.mxu0 %v2170_v3 }
 0x38e   :  { %1966 = vmatmul.mubr.msk.f32.vlgmr.msra.gmra.mrb[8].mxu0 %vm142_vm2, %v550_v20 }
 0x38f   :  { %1975 = vmatprep.mubr.msk.f32.mxu0 %vm2171_vm1, %v2170_v3 }
 0x3b1   :  { %v310_v36 = vpop.xlane.xlu1 %309 }
 0x3b2   :  { %2068 = vrcp.f32 %v310_v36 }
 0x3b5   :  { %v474_v39 = vpop.permute.xlu1 %473 }
 0x3b9   :  { %v977_v4 = vpop.permute.xlu1 %976 }
 0x3bc   :  { %v2069_v37 = vpop.eup %2068 }
 0x3bd   :  { %v316_v38 = vmul.f32 %v2069_v37, %v2065_v30 }
 0x3bf   :  { %1951 = vmatmul.mubr.msk.f32.vlgmr.msra.gmra.mrb[0].mxu1 %vm57_vm0, %v316_v38 }
 0x3c0   :  { %1959 = vmatpush3.xpose.msk.msra.mxu1 %vm142_vm2, %v474_v39  ;;  %1960 = vmatprep.mubr.msk.f32.mxu1 %vm2171_vm1, %v2170_v3  ;;  %v1871_v39 = vld [vmem:[%s2423_s3 + $0x4] sm:$0x3] }
 0x3c1   :  { %1968 = vmatprep.subr.mxu1 %v2170_v3 }
 0x3c3   :  { %1961 = vmatmul.mubr.msk.f32.vlgmr.msra.gmra.mrb[2].mxu1 %vm142_vm2, %v472_v40 }
 0x3c4   :  { %1970 = vmatprep.mubr.msk.f32.mxu1 %vm2171_vm1, %v2170_v3 }
 0x45d   :  { %v2300_v41 = vpop.f32.mrb[6].mxu0 }
 0x45e   :  { %v1957_v42 = vpop.f32.mrb[7].mxu0 }
 0x461   :  { %v623_v43 = vpop.f32.mrb[8].mxu0 }
 0x462   :  { %v628_v44 = vmul.f32 0.70710677, %v623_v43  ;;  %v1967_v45 = vpop.f32.mrb[9].mxu0 }
 0x464   :  { %v632_v46 = vsel %vm57_vm0, %v628_v44, -inf }
 0x465   :  { %633 = vmax.xlane.f32.xlu0 %v632_v46 }
 0x47b   :  { %727 = vrot.lane.b32.xlu0 %v2255_v8, %s2177_s23 }
 0x47f   :  { %974 = vrot.lane.b32.xlu0 %v2252_v7, %s2178_s24 }
 0x483   :  { %1054 = vrot.lane.b32.xlu0 %v2255_v8, %s2176_s22 }
 0x492   :  { %v2307_v47 = vpop.f32.mrb[0].mxu1 }
 0x493   :  { %v1952_v48 = vpop.f32.mrb[1].mxu1 }
 0x496   :  { %v545_v49 = vpop.f32.mrb[2].mxu1 }
 0x497   :  { %v1962_v50 = vpop.f32.mrb[3].mxu1  ;;  %v627_v51 = vmul.f32 0.70710677, %v545_v49 }
 0x499   :  { %v629_v52 = vsel %vm57_vm0, %v627_v51, -inf }
 0x4a2   :  { %630 = vmax.xlane.f32.xlu0 %v629_v52 }
 0x4b8   :  { %651 = vrot.lane.b32.xlu0 %v2252_v7, %s2177_s23 }
 0x4bc   :  { %1154 = vrot.lane.b32.xlu0 %v2252_v7, %s2179_s25 }
 0x4c0   :  { %1396 = vrot.lane.b32.xlu0 %v2252_v7, %s2180_s26 }
 0x4c4   :  { %1474 = vrot.lane.b32.xlu0 %v2255_v8, %s2180_s26 }
 0x4c8   :  { %1394 = vrot.lane.b32.xlu0 %v2252_v7, %s2181_s27 }
 0x4cc   :  { %1472 = vrot.lane.b32.xlu0 %v2255_v8, %s2181_s27 }
 0x4f2   :  { %v634_v53 = vpop.xlane.xlu0 %633 }
 0x4f3   :  { %v636_v54 = vsub.f32 %v628_v44, %v634_v53 }
 0x4f5   :  { %v639_v55 = vmul.f32 1.442695, %v636_v54 }
 0x4f6   :  { %v728_v56 = vpop.permute.xlu0 %727 }
 0x4f7   :  { %2070 = vpow2.f32 %v639_v55  ;;  %1974 = vmatpush3.msra.mxu0 %v728_v56 }
 0x4f8   :  { %1988 = vmatprep.subr.mxu0 %v2170_v3 }
 0x4fa   :  { %v975_v59 = vpop.permute.xlu0 %974 }
 0x4fe   :  { %v1055_v60 = vpop.permute.xlu0 %1054 }
 0x501   :  { %v2071_v57 = vpop.eup %2070 }
 0x502   :  { %v644_v58 = vsel %vm57_vm0, %v2071_v57, 0.0 }
 0x503   :  { %645 = vadd.xlane.f32.xlu1 %v644_v58 }
 0x514   :  { %1052 = vrot.lane.b32.xlu1 %v2255_v8, %s2178_s24 }
 0x52f   :  { %v631_v61 = vpop.xlane.xlu0 %630 }
 0x530   :  { %v635_v62 = vsub.f32 %v627_v51, %v631_v61 }
 0x532   :  { %v637_v63 = vmul.f32 1.442695, %v635_v62 }
 0x533   :  { %v652_v0 = vpop.permute.xlu0 %651 }
 0x534   :  { %2072 = vpow2.f32 %v637_v63  ;;  %1969 = vmatpush3.msra.mxu1 %v652_v0 }
 0x535   :  { %1978 = vmatprep.subr.msk.mxu1 %vm811_vm3, %v1858_v14 }
 0x537   :  { %v1155_v28 = vpop.permute.xlu0 %1154 }
 0x53b   :  { %v1397_v43 = vpop.permute.xlu0 %1396 }
 0x53e   :  { %v2073_v1 = vpop.eup %2072 }
 0x53f   :  { %v641_v2 = vsel %vm57_vm0, %v2073_v1, 0.0 }
 0x540   :  { %642 = vadd.xlane.f32.xlu1 %v641_v2 }
 0x590   :  { %v646_v5 = vpop.xlane.xlu1 %645 }
 0x591   :  { %2074 = vrcp.f32 %v646_v5 }
 0x594   :  { %v1053_v10 = vpop.permute.xlu1 %1052 }
 0x59b   :  { %v2075_v6 = vpop.eup %2074 }
 0x59c   :  { %v650_v9 = vmul.f32 %v2075_v6, %v2071_v57 }
 0x59e   :  { %1976 = vmatmul.mubr.msk.f32.vlgmr.msra.gmra.mrb[10].mxu0 %vm57_vm0, %v650_v9 }
 0x59f   :  { %1989 = vmatpush3.xpose.msk.msra.mxu0 %vm142_vm2, %v977_v4  ;;  %1990 = vmatprep.mubr.msk.f32.mxu0 %vm2171_vm1, %v2170_v3 }
 0x5a0   :  { %1993 = vmatprep.subr.mxu0 %v2170_v3 }
 0x5a2   :  { %1991 = vmatmul.mubr.msk.f32.vlgmr.msra.gmra.mrb[12].mxu0 %vm142_vm2, %v975_v59 }
 0x5a3   :  { %1994 = vmatpush3.xpose.msk.msra.mxu0 %vm142_vm2, %v1055_v60  ;;  %1995 = vmatprep.mubr.msk.f32.mxu0 %vm2171_vm1, %v2170_v3 }
 0x5a4   :  { %2003 = vmatprep.subr.mxu0 %v2170_v3 }
 0x5a6   :  { %1996 = vmatmul.mubr.msk.f32.vlgmr.msra.gmra.mrb[14].mxu0 %vm142_vm2, %v1053_v10 }
 0x5a7   :  { %2005 = vmatprep.mubr.msk.f32.mxu0 %vm2171_vm1, %v2170_v3 }
 0x5cd   :  { %v643_v11 = vpop.xlane.xlu1 %642 }
 0x5ce   :  { %2076 = vrcp.f32 %v643_v11 }
 0x5d8   :  { %v2077_v12 = vpop.eup %2076 }
 0x5d9   :  { %v649_v13 = vmul.f32 %v2077_v12, %v2073_v1 }
 0x5db   :  { %1971 = vmatmul.mubr.msk.f32.vlgmr.msra.gmra.mrb[4].mxu1 %vm57_vm0, %v649_v13 }
 0x5dc   :  { %1979 = vmatpush3.msk.msra.mxu1 %vm811_vm3, %v1858_v14 }
 0x5dd   :  { %1983 = vmatprep.subr.msk.mxu1 %vm811_vm3, %v470_v15 }
 0x671   :  { %v799_v16 = vpop.f32.mrb[10].mxu0 }
 0x672   :  { %v1977_v17 = vpop.f32.mrb[11].mxu0 }
 0x675   :  { %v1048_v18 = vpop.f32.mrb[12].mxu0 }
 0x676   :  { %v1130_v19 = vmul.f32 0.70710677, %v1048_v18  ;;  %v1992_v20 = vpop.f32.mrb[13].mxu0 }
 0x678   :  { %v1132_v21 = vsel %vm57_vm0, %v1130_v19, -inf }
 0x679   :  { %v1126_v22 = vpop.f32.mrb[14].mxu0  ;;  %1133 = vmax.xlane.f32.xlu1 %v1132_v21 }
 0x67a   :  { %v1131_v23 = vmul.f32 0.70710677, %v1126_v22  ;;  %v1997_v24 = vpop.f32.mrb[15].mxu0  ;;  %v1885_v22 = vld [vmem:[%s2424_s4] ss:$0 sm:$0xff] }
 0x67c   :  { %v1135_v25 = vsel %vm57_vm0, %v1131_v23, -inf }
 0x67d   :  { %1136 = vmax.xlane.f32.xlu1 %v1135_v25 }
 0x6ae   :  { %v723_v26 = vpop.f32.mrb[4].mxu1 }
 0x6af   :  { %v1972_v27 = vpop.f32.mrb[5].mxu1  ;;  %1980 = vmatprep.mubr.msk.f32.mxu1 %vm142_vm2, %v723_v26 }
 0x6b0   :  { %1981 = vmatmul.mubr.msk.f32.vlgmr.msra.gmra.mrb[6].mxu1 %vm142_vm2, %v799_v16 }
 0x6b1   :  { %1985 = vmatprep.mubr.msk.f32.mxu1 %vm142_vm2, %v2307_v47  ;;  %1984 = vmatpush3.msk.msra.mxu1 %vm811_vm3, %v470_v15  ;;  %v1475_v47 = vpop.permute.xlu0 %1474 }
 0x6b2   :  { %1998 = vmatprep.subr.mxu1 %v2170_v3 }
 0x6b5   :  { %v1395_v49 = vpop.permute.xlu0 %1394 }
 0x6b8   :  { %1986 = vmatmul.mubr.msk.f32.vlgmr.msra.gmra.mrb[6].mxu1 %vm142_vm2, %v2300_v41 }
 0x6b9   :  { %1999 = vmatpush3.msra.mxu1 %v1155_v28  ;;  %2000 = vmatprep.mubr.msk.f32.mxu1 %vm2171_vm1, %v2170_v3  ;;  %v1473_v54 = vpop.permute.xlu0 %1472 }
 0x6ba   :  { %2008 = vmatprep.subr.msk.mxu1 %vm811_vm3, %v1871_v39 }
 0x706   :  { %v1134_v29 = vpop.xlane.xlu1 %1133 }
 0x707   :  { %v1138_v30 = vsub.f32 %v1130_v19, %v1134_v29 }
 0x709   :  { %v1140_v31 = vmul.f32 1.442695, %v1138_v30 }
 0x70a   :  { %v1137_v32 = vpop.xlane.xlu1 %1136 }
 0x70b   :  { %2078 = vpow2.f32 %v1140_v31  ;;  %v1139_v33 = vsub.f32 %v1131_v23, %v1137_v32 }
 0x70d   :  { %v1142_v34 = vmul.f32 1.442695, %v1139_v33 }
 0x70f   :  { %2080 = vpow2.f32 %v1142_v34 }
 0x715   :  { %v2079_v35 = vpop.eup %2078 }
 0x716   :  { %v1144_v36 = vsel %vm57_vm0, %v2079_v35, 0.0 }
 0x717   :  { %1145 = vadd.xlane.f32.xlu1 %v1144_v36 }
 0x719   :  { %v2081_v37 = vpop.eup %2080 }
 0x71a   :  { %v1147_v38 = vsel %vm57_vm0, %v2081_v37, 0.0 }
 0x71b   :  { %1148 = vadd.xlane.f32.xlu1 %v1147_v38 }
 0x72c   :  { %1230 = vrot.lane.b32.xlu1 %v2255_v8, %s2179_s25 }
 0x7a4   :  { %v1146_v40 = vpop.xlane.xlu1 %1145 }
 0x7a5   :  { %2082 = vrcp.f32 %v1146_v40 }
 0x7a8   :  { %v1149_v41 = vpop.xlane.xlu1 %1148 }
 0x7a9   :  { %2084 = vrcp.f32 %v1149_v41 }
 0x7ac   :  { %v1231_v42 = vpop.permute.xlu1 %1230 }
 0x7ad   :  { %2004 = vmatpush3.msra.mxu0 %v1231_v42 }
 0x7ae   :  { %2013 = vmatprep.subr.mxu0 %v2170_v3 }
 0x7af   :  { %v2083_v44 = vpop.eup %2082 }
 0x7b0   :  { %v1152_v45 = vmul.f32 %v2083_v44, %v2079_v35 }
 0x7b2   :  { %2001 = vmatmul.mubr.msk.f32.vlgmr.msra.gmra.mrb[8].mxu1 %vm57_vm0, %v1152_v45 }
 0x7b3   :  { %v2085_v46 = vpop.eup %2084  ;;  %2009 = vmatpush3.msk.msra.mxu1 %vm811_vm3, %v1871_v39 }
 0x7b4   :  { %v1153_v48 = vmul.f32 %v2085_v46, %v2081_v37  ;;  %2018 = vmatprep.subr.mxu1 %v2170_v3 }
 0x7b6   :  { %2006 = vmatmul.mubr.msk.f32.vlgmr.msra.gmra.mrb[16].mxu0 %vm57_vm0, %v1153_v48 }
 0x7b7   :  { %2014 = vmatpush3.xpose.msk.msra.mxu0 %vm142_vm2, %v1397_v43  ;;  %2015 = vmatprep.mubr.msk.f32.mxu0 %vm2171_vm1, %v2170_v3 }
 0x7b8   :  { %2023 = vmatprep.subr.mxu0 %v2170_v3 }
 0x7ba   :  { %2016 = vmatmul.mubr.msk.f32.vlgmr.msra.gmra.mrb[18].mxu0 %vm142_vm2, %v1395_v49 }
 0x7bb   :  { %2025 = vmatprep.mubr.msk.f32.mxu0 %vm2171_vm1, %v2170_v3 }
 0x885   :  { %v1226_v50 = vpop.f32.mrb[8].mxu1 }
 0x886   :  { %v2002_v51 = vpop.f32.mrb[9].mxu1  ;;  %2010 = vmatprep.mubr.msk.f32.mxu1 %vm142_vm2, %v1226_v50 }
 0x889   :  { %v1302_v52 = vpop.f32.mrb[16].mxu0 }
 0x88a   :  { %v2007_v53 = vpop.f32.mrb[17].mxu0  ;;  %2011 = vmatmul.mubr.msk.f32.vlgmr.msra.gmra.mrb[6].mxu1 %vm142_vm2, %v1302_v52 }
 0x88b   :  { %2019 = vmatpush3.xpose.msk.msra.mxu1 %vm142_vm2, %v1475_v47  ;;  %2020 = vmatprep.mubr.msk.f32.mxu1 %vm2171_vm1, %v2170_v3 }
 0x88c   :  { %2028 = vmatprep.subr.mxu1 %v2170_v3 }
 0x88d   :  { %v1468_v55 = vpop.f32.mrb[18].mxu0 }
 0x88e   :  { %v1550_v56 = vmul.f32 0.70710677, %v1468_v55  ;;  %v2017_v57 = vpop.f32.mrb[19].mxu0  ;;  %2021 = vmatmul.mubr.msk.f32.vlgmr.msra.gmra.mrb[10].mxu1 %vm142_vm2, %v1473_v54 }
 0x88f   :  { %2030 = vmatprep.mubr.msk.f32.mxu1 %vm2171_vm1, %v2170_v3 }
 0x890   :  { %v1552_v58 = vsel %vm57_vm0, %v1550_v56, -inf }
 0x891   :  { %1553 = vmax.xlane.f32.xlu1 %v1552_v58 }
 0x91e   :  { %v1554_v59 = vpop.xlane.xlu1 %1553 }
 0x91f   :  { %v1558_v60 = vsub.f32 %v1550_v56, %v1554_v59 }
 0x921   :  { %v1560_v61 = vmul.f32 1.442695, %v1558_v60 }
 0x923   :  { %2086 = vpow2.f32 %v1560_v61 }
 0x92d   :  { %v2087_v2 = vpop.eup %2086 }
 0x92e   :  { %v1564_v4 = vsel %vm57_vm0, %v2087_v2, 0.0 }
 0x961   :  { %v1546_v62 = vpop.f32.mrb[10].mxu1 }
 0x962   :  { %v1551_v63 = vmul.f32 0.70710677, %v1546_v62  ;;  %v2022_v0 = vpop.f32.mrb[11].mxu1 }
 0x964   :  { %v1555_v1 = vsel %vm57_vm0, %v1551_v63, -inf }
 0x965   :  { %1556 = vmax.xlane.f32.xlu0 %v1555_v1 }
 0x969   :  { %1565 = vadd.xlane.f32.xlu0 %v1564_v4 }
 0x97f   :  { %1574 = vrot.lane.b32.xlu0 %v2252_v7, %s2182_s11  ;;  %v1881_v7 = vld [vmem:[%s2423_s3 + $0x6] sm:$0x3] }
 0x9f2   :  { %v1557_v3 = vpop.xlane.xlu0 %1556 }
 0x9f3   :  { %v1559_v5 = vsub.f32 %v1551_v63, %v1557_v3 }
 0x9f5   :  { %v1562_v6 = vmul.f32 1.442695, %v1559_v5 }
 0x9f6   :  { %v1566_v9 = vpop.xlane.xlu0 %1565 }
 0x9f7   :  { %2088 = vpow2.f32 %v1562_v6 }
 0x9f8   :  { %2090 = vrcp.f32 %v1566_v9 }
 0x9fa   :  { %v1575_v10 = vpop.permute.xlu0 %1574 }
 0x9fb   :  { %2024 = vmatpush3.msra.mxu0 %v1575_v10 }
 0xa01   :  { %v2089_v11 = vpop.eup %2088 }
 0xa02   :  { %v2091_v12 = vpop.eup %2090  ;;  %v1567_v13 = vsel %vm57_vm0, %v2089_v11, 0.0 }
 0xa03   :  { %v1572_v14 = vmul.f32 %v2091_v12, %v2087_v2  ;;  %1568 = vadd.xlane.f32.xlu1 %v1567_v13 }
 0xa05   :  { %2026 = vmatmul.mubr.msk.f32.vlgmr.msra.gmra.mrb[20].mxu0 %vm57_vm0, %v1572_v14 }
 0xa14   :  { %1650 = vrot.lane.b32.xlu1 %v2255_v8, %s2182_s11 }
 0xa90   :  { %v1569_v15 = vpop.xlane.xlu1 %1568 }
 0xa91   :  { %2092 = vrcp.f32 %v1569_v15 }
 0xa94   :  { %v1651_v16 = vpop.permute.xlu1 %1650 }
 0xa95   :  { %2029 = vmatpush3.msra.mxu1 %v1651_v16 }
 0xa96   :  { %2033 = vmatprep.subr.msk.mxu1 %vm811_vm3, %v1881_v7 }
 0xa9b   :  { %v2093_v17 = vpop.eup %2092 }
 0xa9c   :  { %v1573_v18 = vmul.f32 %v2093_v17, %v2089_v11 }
 0xa9e   :  { %2031 = vmatmul.mubr.msk.f32.vlgmr.msra.gmra.mrb[12].mxu1 %vm57_vm0, %v1573_v18 }
 0xa9f   :  { %2034 = vmatpush3.msk.msra.mxu1 %vm811_vm3, %v1881_v7 }
 0xad8   :  { %v1646_v19 = vpop.f32.mrb[20].mxu0 }
 0xad9   :  { %v2027_v20 = vpop.f32.mrb[21].mxu0  ;;  %2035 = vmatprep.mubr.msk.f32.mxu1 %vm142_vm2, %v1646_v19 }
 0xb71   :  { %v1722_v8 = vpop.f32.mrb[12].mxu1 }
 0xb72   :  { %v2032_v21 = vpop.f32.mrb[13].mxu1  ;;  %2036 = vmatmul.mubr.msk.f32.vlgmr.msra.gmra.mrb[6].mxu1 %vm142_vm2, %v1722_v8 }
 0xc45   :  { %v2037_v23 = vpop.f32.mrb[6].mxu1 }
 0xc46   :  { %v1822_v24 = vadd.f32 %v2037_v23, %v1885_v22  ;;  %v1803_v25 = vpop.f32.mrb[7].mxu1 }
 0xc47   :  { %v1821_v26 = vadd.f32 %v1885_v22, %v1803_v25 }
 0xc48   :  { %1824 = vst.msk [vmem:[#allocation7 + $0x8] sm:$0xff] %vm57_vm0, %v1822_v24 }
 0xc49   :  { %1823 = vst.msk [vmem:[#allocation7] sm:$0xff] %vm57_vm0, %v1821_v26 }
 0xc4a   :  { %2149 = shalt.err (!%p2146_p6)
}
 0xc4b   :  { %s2150_s1 = scalar_lea.hbm %s2425_s5, 256 }
 0xc4c   :  { %p2151_p7 = scmp.ne.s32.totalorder %s2425_s5, %s2150_s1  ;;  %p2154_p8 = scmp.lt.u32.totalorder %s2150_s1, %s2425_s5 }
 0xc4e   :  { %p2156_p9 = pnand %p2154_p8, %p2151_p7 }
 0xc50   :  { %2159 = shalt.err (!%p2156_p9)
}
 0xc51   :  { %1836 = dma.vmem_to_hbm [thread:$0]  %s1831_s16, 256, %s2425_s5, [#allocation4], %s2167_s28, %s2167_s28, %s2168_s29  }
 0xc52   :  { %2164 = dma.done.wait [#allocation4], 256  }
 0xc53   :  { %2165 = vsyncadd [#allocation4], 4294967040 }
 0xc54   :  { %1840 = vsyncpa [#allocation3], 1 }
 0xc55   :  { %1841 = vsyncpa [#allocation6], 1 }
 0xc56   :  { %1842 = vsyncpa [#allocation4], 1 }

</bundles_post_ra>
